<compile_context>
chip_gen: v6e
topology: v6e:2x2x1
jax: 0.10.0
libtpu: 0.0.40
codegen_flags: <defaults>
</compile_context>

<pallas_src>
import functools

import jax
import jax.numpy as jnp
from jax.experimental import pallas as pl
from jax.experimental.pallas import tpu as pltpu


# 3x3 tap offsets, k = (dy+1)*3 + (dx+1) == kh*3 + kw (matches weight layout).
_OFFSETS = tuple((dy, dx) for dy in (-1, 0, 1) for dx in (-1, 0, 1))


@functools.lru_cache(maxsize=None)
def _roll_sign() -> int:
    """Probe pltpu.roll's shift convention once.

    Returns +1 if pltpu.roll(x, s)[i] == x[(i - s) % n] (jnp.roll convention),
    -1 otherwise.  The probe and the main kernel both run compiled on the
    default (TPU) backend, so the cached sign cannot mismatch the kernel.
    """
    def k(x_ref, o_ref):
        o_ref[...] = pltpu.roll(x_ref[...], 1, axis=1)

    x = jnp.arange(128, dtype=jnp.float32).reshape(1, 128)
    y = pl.pallas_call(k, out_shape=jax.ShapeDtypeStruct((1, 128), jnp.float32))(x)
    return 1 if int(y[0, 1]) == 0 else -1


def _resblock_kernel(w1_ref, w2_ref, mask_ref, x_ref, out_ref, taps_ref, *,
                     C, H, W, B, eps, roll_sign):
    """One grid step = B images, lane-dense layout (C, B*H*W).

    w1_ref:   VMEM (2C, 9C)  im2col conv1 weights, columns ordered (kh, kw, cin)
    w2_ref:   VMEM (C,  9C)  im2col conv2 weights
    mask_ref: VMEM (9, HW)   f32 0/1 border masks, one row per 3x3 tap
    x_ref:    VMEM (C, B*HW) input images (channels on sublanes, pixels on lanes)
    out_ref:  VMEM (C, B*HW)
    taps_ref: VMEM (9C, HW)  im2col scratch, reused by both convs
    """
    HW = H * W
    inv_hw = 1.0 / HW

    def im2col(blk):
        """Write the 9 masked 3x3 taps of blk (C, HW) into taps_ref -> (9C, HW)."""
        for k, (dy, dx) in enumerate(_OFFSETS):
            s = dy * W + dx
            if s == 0:
                t = blk
            else:
                t = pltpu.roll(blk, (-roll_sign * s) % HW, axis=1)
            # Zero the taps that fall outside the image (border handling).
            taps_ref[pl.ds(k * C, C), :] = t * mask_ref[pl.ds(k, 1), :]
        return taps_ref[...]

    def inorm(y):
        """InstanceNorm2d (affine=False), per-channel, two-pass variance."""
        m = jnp.sum(y, axis=1, keepdims=True) * inv_hw
        d = y - m
        var = jnp.sum(d * d, axis=1, keepdims=True) * inv_hw
        return d * jax.lax.rsqrt(var + eps)

    for b in range(B):                       # static unroll, B is small
        lanes = pl.ds(b * HW, HW)
        xb = x_ref[:, lanes]                                        # (C, HW)

        # conv1 (C -> 2C) on the MXU, InstanceNorm, GLU.
        h1 = jnp.dot(w1_ref[...], im2col(xb),
                     preferred_element_type=jnp.float32)            # (2C, HW)
        n1 = inorm(h1)
        g = n1[:C, :] * jax.nn.sigmoid(n1[C:, :])                   # (C, HW)

        # conv2 (C -> C) on the MXU, InstanceNorm, residual; one slab store.
        h2 = jnp.dot(w2_ref[...], im2col(g),
                     preferred_element_type=jnp.float32)            # (C, HW)
        out_ref[:, lanes] = inorm(h2) + xb


def _images_per_block(N, HW, C):
    """Largest B dividing N that keeps >= 2 grid steps (v7x megacore), keeps the
    block lane dim 128-aligned and the block comfortably small in VMEM."""
    vmem_cap = 2 * 1024 * 1024               # tiny vs 64 MiB (v7x) / 128 MiB VMEM
    best = 1
    for b in range(1, N + 1):
        if N % b:
            continue
        if N >= 2 and N // b < 2:             # keep both v7x TensorCores busy
            continue
        if (b * HW) % 128 and b != N:         # lane dim must be 128-aligned
            continue
        if b * C * HW * 4 > vmem_cap:
            continue
        best = b
    if (best * HW) % 128 != 0:                # fall back to a full-array block
        best = N
    return best


def resblock_pallas(x, w1_hwio, w2_hwio, *, eps=1e-5):
    """x: (N, C, H, W) f32; w1_hwio: (3,3,C,2C); w2_hwio: (3,3,C,C)."""
    N, C, H, W = x.shape
    HW = H * W
    C2 = 2 * C
    B = _images_per_block(N, HW, C)
    assert N % B == 0
    BHW = B * HW

    # Lane-dense layout: channels on sublanes, (image, h, w) flattened on lanes.
    x_flat = jnp.transpose(x, (1, 0, 2, 3)).reshape(C, N * HW).astype(jnp.float32)

    # im2col weights: column index = (kh*3 + kw)*C + cin, matching the tap order.
    w1_2d = jnp.transpose(w1_hwio.astype(jnp.float32), (3, 0, 1, 2)).reshape(C2, 9 * C)
    w2_2d = jnp.transpose(w2_hwio.astype(jnp.float32), (3, 0, 1, 2)).reshape(C, 9 * C)

    # Precomputed 0/1 border masks for the 9 taps (hoisted off the VALU slot).
    p = jnp.arange(HW, dtype=jnp.int32)
    row, col = p // W, p % W
    mask_rows = []
    for dy, dx in _OFFSETS:
        ok = jnp.ones((HW,), dtype=bool)
        if dy == -1:
            ok = ok & (row >= 1)
        elif dy == 1:
            ok = ok & (row <= H - 2)
        if dx == -1:
            ok = ok & (col >= 1)
        elif dx == 1:
            ok = ok & (col <= W - 2)
        mask_rows.append(ok)
    mask = jnp.stack(mask_rows).astype(jnp.float32)                  # (9, HW)

    kernel = functools.partial(_resblock_kernel, C=C, H=H, W=W, B=B, eps=eps,
                               roll_sign=_roll_sign())

    cost = pl.CostEstimate(
        flops=2 * 9 * C * (C2 + C) * HW * N,
        transcendentals=N * (C * HW + 3 * C),
        bytes_accessed=(2 * N * C * HW + 9 * C * (C2 + C) + 9 * HW) * 4)

    out_flat = pl.pallas_call(
        kernel,
        out_shape=jax.ShapeDtypeStruct((C, N * HW), jnp.float32),
        grid_spec=pltpu.PrefetchScalarGridSpec(
            num_scalar_prefetch=0,
            grid=(N // B,),
            in_specs=[
                pl.BlockSpec((C2, 9 * C), lambda n: (0, 0)),   # w1 (constant)
                pl.BlockSpec((C, 9 * C), lambda n: (0, 0)),    # w2 (constant)
                pl.BlockSpec((9, HW), lambda n: (0, 0)),       # border masks
                pl.BlockSpec((C, BHW), lambda n: (0, n)),      # B input images
            ],
            out_specs=pl.BlockSpec((C, BHW), lambda n: (0, n)),
            scratch_shapes=[pltpu.VMEM((9 * C, HW), jnp.float32)],
        ),
        compiler_params=pltpu.CompilerParams(
            dimension_semantics=("parallel",)),                 # independent images
        cost_estimate=cost,
    )(w1_2d, w2_2d, mask, x_flat)

    return jnp.transpose(out_flat.reshape(C, N, H, W), (1, 0, 2, 3))


def resblock_ref(x, w1_hwio, w2_hwio, *, eps=1e-5):
    """Pure-JAX reference of the PyTorch ResBlock forward (NCHW)."""
    dn = ("NCHW", "HWIO", "NCHW")

    def inorm(y):
        mean = jnp.mean(y, axis=(2, 3), keepdims=True)
        var = jnp.mean((y - mean) ** 2, axis=(2, 3), keepdims=True)
        return (y - mean) / jnp.sqrt(var + eps)

    C = x.shape[1]
    h = jax.lax.conv_general_dilated(x, w1_hwio, (1, 1), "SAME",
                                     dimension_numbers=dn)
    h = inorm(h)
    h = h[:, :C] * jax.nn.sigmoid(h[:, C:])
    h = jax.lax.conv_general_dilated(h, w2_hwio, (1, 1), "SAME",
                                     dimension_numbers=dn)
    h = inorm(h)
    return h + x


if __name__ == "__main__":
    N, C, H, W = 2, 4, 16, 16

    key = jax.random.PRNGKey(0)
    kx, k1, k2 = jax.random.split(key, 3)
    x = jax.random.normal(kx, (N, C, H, W), dtype=jnp.float32)
    # Deterministic synthetic weights (HWIO layout), no bias (conv3x3 bias=False).
    w1 = 0.1 * jax.random.normal(k1, (3, 3, C, 2 * C), dtype=jnp.float32)
    w2 = 0.1 * jax.random.normal(k2, (3, 3, C, C), dtype=jnp.float32)

    out = resblock_pallas(x, w1, w2)
    out = jax.block_until_ready(out)

    ref = resblock_ref(x, w1, w2)
    assert out.shape == (N, C, H, W)
    assert jnp.allclose(out, ref, atol=1e-3, rtol=1e-3), (
        float(jnp.max(jnp.abs(out - ref))))

    print("KERNEL_OK")
</pallas_src>

<mosaic_0001>
module attributes {stable_mosaic.version = 11 : i64} {
  func.func @k(%arg0: memref<1x128xf32, #tpu.memory_space<vmem>>, %arg1: memref<1x128xf32, #tpu.memory_space<vmem>>) attributes {dimension_semantics = [], scalar_prefetch = 0 : i64, scratch_operands = 0 : i64, tpu.core_type = #tpu.core_type<tc>} {
    %c0 = arith.constant 0 : index
    %c0_0 = arith.constant 0 : index
    %0 = vector.load %arg0[%c0, %c0_0] : memref<1x128xf32, #tpu.memory_space<vmem>>, vector<1x128xf32>
    %c1_i32 = arith.constant 1 : i32
    %1 = tpu.dynamic_rotate %0 by %c1_i32 dim 1 : vector<1x128xf32>, i32 -> vector<1x128xf32>
    %c0_1 = arith.constant 0 : index
    %c0_2 = arith.constant 0 : index
    %2 = vector.load %arg1[%c0_1, %c0_2] : memref<1x128xf32, #tpu.memory_space<vmem>>, vector<1x128xf32>
    tpu.vector_store %arg1[%c0_1, %c0_2], %1 {strides = array<i32>} : memref<1x128xf32, #tpu.memory_space<vmem>>, vector<1x128xf32>,
    return
  }
}

</mosaic_0001>

<bundles_post_ra>
// kernel: tpu_custom_call.1
= control target key start
LH: loop header
LB: loop body
LE: loop exit
PB: predicated region body
PF: predicated region fallthrough
CT: control target
= control target key end

     0   :  { %6 = vsyncpa [#allocation3], 0  ;;  %s106_s0 = inlined_call_operand.hbm [shape: f32[1,128], index: 0, kind: input, shape index: {}]   ;;  %s107_s1 = inlined_call_operand.hbm [shape: f32[1,128], index: 1, kind: output, shape index: {}]  }
   0x1   :  { %7 = vsyncpa [#allocation4], 0  ;;  %s87_s6 = smov [#allocation2]  }
   0x2   :  { %s14_s7 = sshll.u32 %s87_s6, 4  ;;  %s15_s7 = int_to_ptr.vmem [resolvable:$true] %s14_s7 }
   0x3   :  { %s51_s8 = scalar_lea.vmem %s15_s7, 16  ;;  %s55_s9 = scalar_lea.vmem %s15_s7, 32 }
   0x4   :  { %p52_p0 = scmp.ne.s32.totalorder %s15_s7, %s51_s8  ;;  %p56_p1 = scmp.lt.s32.totalorder %s15_s7, %s15_s7 }
   0x5   :  { %p57_p2 = scmp.lt.s32.totalorder %s55_s9, %s51_s8 }
   0x7   :  { %p58_p3 = por %p57_p2, %p56_p1 }
   0x9   :  { %p59_p4 = pnand %p58_p3, %p52_p0 }
   0xb   :  { %62 = shalt.err (!%p59_p4)
}
   0xc   :  { %17 = dma.hbm_to_vmem [thread:$0]  %s106_s0, 16, %s15_s7, [#allocation3]  }
   0xd   :  { %83 = dma.done.wait [#allocation3], 16  }
   0xe   :  { %84 = vsyncadd [#allocation3], 4294967280  ;;  %v21_v0 = vld [vmem:[#allocation2] sm:$0x1]  ;;  %s88_s12 = smov 1   ;;  %s89_s13 = smov [#allocation5]  }
   0xf   :  { %22 = vrot.lane.b32.xlu0 %v21_v0, %s88_s12  ;;  %s31_s14 = sshll.u32 %s89_s13, 4  ;;  %s32_s14 = int_to_ptr.vmem [resolvable:$true] %s31_s14 }
  0x10   :  { %s63_s15 = scalar_lea.vmem %s32_s14, 16  ;;  %s67_s16 = scalar_lea.vmem %s32_s14, 32 }
  0x11   :  { %p64_p5 = scmp.ne.s32.totalorder %s32_s14, %s63_s15  ;;  %p68_p6 = scmp.lt.s32.totalorder %s32_s14, %s32_s14 }
  0x12   :  { %p69_p7 = scmp.lt.s32.totalorder %s67_s16, %s63_s15 }
  0x14   :  { %p70_p8 = por %p69_p7, %p68_p6 }
  0x16   :  { %p71_p9 = pnand %p70_p8, %p64_p5 }
  0x81   :  { %v23_v1 = vpop.permute.xlu0 %22 }
  0x82   :  { %24 = vst [vmem:[#allocation5] sm:$0x1] %v23_v1 }
  0x83   :  { %74 = shalt.err (!%p71_p9)
}
  0x84   :  { %34 = dma.vmem_to_hbm [thread:$0]  %s32_s14, 16, %s107_s1, [#allocation4]  }
  0x85   :  { %85 = dma.done.wait [#allocation4], 16  }
  0x86   :  { %86 = vsyncadd [#allocation4], 4294967280 }
  0x87   :  { %38 = vsyncpa [#allocation3], 1 }
  0x88   :  { %39 = vsyncpa [#allocation4], 1 }

</bundles_post_ra>
